<compile_context>
chip_gen: v5e
topology: v5e:2x2
jax: 0.10.0
libtpu: 0.0.40
codegen_flags: <defaults>
</compile_context>

<pallas_src>
import functools

import jax
import jax.numpy as jnp
from jax.experimental import pallas as pl
from jax.experimental.pallas import tpu as pltpu


# ----------------------------------------------------------------------------
# Single fused kernel (transposed activation layout: tokens on the lane axis)
#
#   xT    : (H, B*S)  bf16  embedded tokens, transposed
#   maskT : (1, B*S)  f32   attention mask row
#   w1    : (H, H)    bf16  encoder dense weight (hT = w1 @ xT)
#   b1    : (H, 1)    f32
#   wq    : (2, H)    bf16  QA head (row 0 -> start, row 1 -> end)
#   bq    : (2, 1)    f32
#   wsT   : (S, S)    bf16  start span classifier, pre-transposed (W.T)
#   bs    : (1, S)    f32
#   weT   : (S, S)    bf16  end span classifier, pre-transposed (W.T)
#   be    : (1, S)    f32
#   outputs: start_logits (B, S) f32, end_logits (B, S) f32
# ----------------------------------------------------------------------------
def fused_qa_kernel(xT_ref, maskT_ref, w1_ref, b1_ref, wq_ref, bq_ref,
                    wsT_ref, bs_ref, weT_ref, be_ref,
                    start_ref, end_ref, *, batch, seq):
    # encoder dense + ReLU, then attention mask (f32 epilogue).
    # NOTE: mask zeroes hidden states *after* ReLU; the QA-head bias is still
    # added afterwards (matches the synthetic spec of the previous version).
    hT = jnp.dot(w1_ref[...], xT_ref[...],
                 preferred_element_type=jnp.float32)            # (H, B*S) f32
    hT = jnp.maximum(hT + b1_ref[...], 0.0) * maskT_ref[...]

    # QA head -> raw start/end logits, lane-dense: (2, B*S)
    qaT = jnp.dot(wq_ref[...], hT.astype(jnp.bfloat16),
                  preferred_element_type=jnp.float32) + bq_ref[...]

    # Regroup tokens into (B, S) rows (static lane slices + sublane concat;
    # stays entirely in vregs — no HBM round trip, no narrow stores).
    start_raw = jnp.concatenate(
        [qaT[0:1, b * seq:(b + 1) * seq] for b in range(batch)], axis=0)
    end_raw = jnp.concatenate(
        [qaT[1:2, b * seq:(b + 1) * seq] for b in range(batch)], axis=0)

    # Span classifiers: logits = raw @ W.T + b  (W.T precomputed at init).
    start_ref[...] = (
        jnp.dot(start_raw.astype(jnp.bfloat16), wsT_ref[...],
                preferred_element_type=jnp.float32) + bs_ref[...])
    end_ref[...] = (
        jnp.dot(end_raw.astype(jnp.bfloat16), weT_ref[...],
                preferred_element_type=jnp.float32) + be_ref[...])


def fused_qa_forward(xT, maskT, w1, b1, wq, bq, wsT, bs, weT, be,
                     *, batch, seq):
    full = lambda shape: pl.BlockSpec(shape, lambda i: (0,) * len(shape))
    kernel = functools.partial(fused_qa_kernel, batch=batch, seq=seq)
    return pl.pallas_call(
        kernel,
        out_shape=(jax.ShapeDtypeStruct((batch, seq), jnp.float32),
                   jax.ShapeDtypeStruct((batch, seq), jnp.float32)),
        grid=(1,),
        in_specs=[full(xT.shape), full(maskT.shape),
                  full(w1.shape), full(b1.shape),
                  full(wq.shape), full(bq.shape),
                  full(wsT.shape), full(bs.shape),
                  full(weT.shape), full(be.shape)],
        out_specs=(full((batch, seq)), full((batch, seq))),
        compiler_params=pltpu.CompilerParams(
            dimension_semantics=("arbitrary",)),
    )(xT, maskT, w1, b1, wq, bq, wsT, bs, weT, be)


# ----------------------------------------------------------------------------
# JAX glue (embedding gather + layout plumbing) + kernel, under one jit.
# ----------------------------------------------------------------------------
@jax.jit
def _qa_forward(params, input_ids, attention_mask, token_type_ids):
    B, S = input_ids.shape
    # Embedding gather stays in plain JAX (tiny, no clean Pallas equivalent).
    x = params["word_emb"][input_ids] + params["type_emb"][token_type_ids]
    H = x.shape[-1]
    # Layout plumbing outside the kernel: tokens onto the 128-lane axis.
    xT = x.reshape(B * S, H).T.astype(jnp.bfloat16)        # (H, B*S)
    maskT = attention_mask.reshape(1, B * S).astype(jnp.float32)
    return fused_qa_forward(
        xT, maskT,
        params["w1"], params["b1"], params["wq"], params["bq"],
        params["ws_t"], params["bs"], params["we_t"], params["be"],
        batch=B, seq=S)


# ----------------------------------------------------------------------------
# Model wrapper
# ----------------------------------------------------------------------------
class OpenDomainQAPallas:
    def __init__(self, vocab_size=50, max_seq_len=8, hidden=32, seed=1):
        self.S = max_seq_len
        self.H = hidden
        self.V = vocab_size
        k = jax.random.PRNGKey(seed)
        ks = jax.random.split(k, 10)

        def lin_init(key, out_f, in_f):
            bound = 1.0 / (in_f ** 0.5)
            kw, kb = jax.random.split(key)
            w = jax.random.uniform(kw, (out_f, in_f), jnp.float32, -bound, bound)
            b = jax.random.uniform(kb, (out_f,), jnp.float32, -bound, bound)
            return w, b

        # synthetic transformer parameters
        word_emb = jax.random.normal(ks[0], (vocab_size, hidden),
                                     jnp.float32) * 0.02
        type_emb = jax.random.normal(ks[1], (2, hidden), jnp.float32) * 0.02

        # encoder dense:  h = x @ W1.T + b1   ->  hT = W1 @ xT + b1_col
        w_enc, b_enc = lin_init(ks[2], hidden, hidden)
        # QA head:        qa = h @ WQ.T + bq  ->  qaT = WQ @ hT + bq_col
        w_qa, b_qa = lin_init(ks[3], 2, hidden)
        # span classifiers: nn.Linear(MAX_SEQUENCE_LENGTH, MAX_SEQUENCE_LENGTH)
        w_start, b_start = lin_init(ks[4], max_seq_len, max_seq_len)
        w_end, b_end = lin_init(ks[5], max_seq_len, max_seq_len)

        # MXU operands stored in bf16; biases / mask epilogue stay f32.
        self.params = {
            "word_emb": word_emb,
            "type_emb": type_emb,
            "w1": w_enc.astype(jnp.bfloat16),                 # (H, H)
            "b1": b_enc.reshape(hidden, 1),                   # (H, 1) f32
            "wq": w_qa.astype(jnp.bfloat16),                  # (2, H)
            "bq": b_qa.reshape(2, 1),                         # (2, 1) f32
            "ws_t": w_start.T.astype(jnp.bfloat16),           # (S, S) pre-transposed
            "bs": b_start.reshape(1, max_seq_len),            # (1, S) f32
            "we_t": w_end.T.astype(jnp.bfloat16),             # (S, S) pre-transposed
            "be": b_end.reshape(1, max_seq_len),              # (1, S) f32
        }
        # TODO(synk): dropout(0.2) is declared in the reference __init__ but
        # never used in forward(); omitted.

    def forward(self, input_ids, attention_mask, token_type_ids,
                start_positions=None, end_positions=None):
        start_logits, end_logits = _qa_forward(
            self.params, input_ids, attention_mask, token_type_ids)
        # TODO(synk): cross-entropy loss & sklearn f1 monitoring only apply
        # when start/end positions are provided (None here -> None / {}).
        loss = None
        metric = {}
        return (start_logits, end_logits), loss, metric


if __name__ == "__main__":
    B, S, H, V = 2, 8, 32, 50
    key = jax.random.PRNGKey(0)
    k_ids, k_types = jax.random.split(key)
    input_ids = jax.random.randint(k_ids, (B, S), 0, V, dtype=jnp.int32)
    attention_mask = jnp.ones((B, S), dtype=jnp.int32)
    token_type_ids = jax.random.randint(k_types, (B, S), 0, 2, dtype=jnp.int32)

    model = OpenDomainQAPallas(vocab_size=V, max_seq_len=S, hidden=H)
    (start_logits, end_logits), loss, metric = model.forward(
        input_ids, attention_mask, token_type_ids)

    jax.block_until_ready(start_logits)
    jax.block_until_ready(end_logits)
    assert start_logits.shape == (B, S) and end_logits.shape == (B, S)
    assert bool(jnp.all(jnp.isfinite(start_logits)))
    assert bool(jnp.all(jnp.isfinite(end_logits)))
    assert loss is None and metric == {}
    print("KERNEL_OK")
</pallas_src>

<mosaic_0001>
module attributes {stable_mosaic.version = 11 : i64} {
  func.func @fused_qa_kernel(%arg0: i32, %arg1: memref<32x16xbf16, #tpu.memory_space<vmem>>, %arg2: memref<1x16xf32, #tpu.memory_space<vmem>>, %arg3: memref<32x32xbf16, #tpu.memory_space<vmem>>, %arg4: memref<32x1xf32, #tpu.memory_space<vmem>>, %arg5: memref<2x32xbf16, #tpu.memory_space<vmem>>, %arg6: memref<2x1xf32, #tpu.memory_space<vmem>>, %arg7: memref<8x8xbf16, #tpu.memory_space<vmem>>, %arg8: memref<1x8xf32, #tpu.memory_space<vmem>>, %arg9: memref<8x8xbf16, #tpu.memory_space<vmem>>, %arg10: memref<1x8xf32, #tpu.memory_space<vmem>>, %arg11: memref<2x8xf32, #tpu.memory_space<vmem>>, %arg12: memref<2x8xf32, #tpu.memory_space<vmem>>) attributes {dimension_semantics = [#tpu.dimension_semantics<arbitrary>], iteration_bounds = array<i64: 1>, scalar_prefetch = 0 : i64, scratch_operands = 0 : i64, tpu.core_type = #tpu.core_type<tc>, window_params = [{pipeline_mode = #tpu.pipeline_mode<synchronous>, transform_indices = @transform_0, window_bounds = array<i64: 32, 16>}, {pipeline_mode = #tpu.pipeline_mode<synchronous>, transform_indices = @transform_1, window_bounds = array<i64: 1, 16>}, {pipeline_mode = #tpu.pipeline_mode<synchronous>, transform_indices = @transform_2, window_bounds = array<i64: 32, 32>}, {pipeline_mode = #tpu.pipeline_mode<synchronous>, transform_indices = @transform_3, window_bounds = array<i64: 32, 1>}, {pipeline_mode = #tpu.pipeline_mode<synchronous>, transform_indices = @transform_4, window_bounds = array<i64: 2, 32>}, {pipeline_mode = #tpu.pipeline_mode<synchronous>, transform_indices = @transform_5, window_bounds = array<i64: 2, 1>}, {pipeline_mode = #tpu.pipeline_mode<synchronous>, transform_indices = @transform_6, window_bounds = array<i64: 8, 8>}, {pipeline_mode = #tpu.pipeline_mode<synchronous>, transform_indices = @transform_7, window_bounds = array<i64: 1, 8>}, {pipeline_mode = #tpu.pipeline_mode<synchronous>, transform_indices = @transform_8, window_bounds = array<i64: 8, 8>}, {pipeline_mode = #tpu.pipeline_mode<synchronous>, transform_indices = @transform_9, window_bounds = array<i64: 1, 8>}, {pipeline_mode = #tpu.pipeline_mode<synchronous>, transform_indices = @transform_10, window_bounds = array<i64: 2, 8>}, {pipeline_mode = #tpu.pipeline_mode<synchronous>, transform_indices = @transform_11, window_bounds = array<i64: 2, 8>}]} {
    %c0 = arith.constant 0 : index
    %c0_0 = arith.constant 0 : index
    %0 = vector.load %arg3[%c0, %c0_0] : memref<32x32xbf16, #tpu.memory_space<vmem>>, vector<32x32xbf16>
    %c0_1 = arith.constant 0 : index
    %c0_2 = arith.constant 0 : index
    %1 = vector.load %arg1[%c0_1, %c0_2] : memref<32x16xbf16, #tpu.memory_space<vmem>>, vector<32x16xbf16>
    %cst = arith.constant dense<0.000000e+00> : vector<32x16xf32>
    %2 = tpu.matmul %0, %1, %cst {dimension_numbers = #tpu.dot_dimension_numbers<[1], [0], [0], [1], [0, 0, 1, 1], [], []>} : vector<32x32xbf16>, vector<32x16xbf16>, vector<32x16xf32> -> vector<32x16xf32>
    %c0_3 = arith.constant 0 : index
    %c0_4 = arith.constant 0 : index
    %3 = vector.load %arg4[%c0_3, %c0_4] : memref<32x1xf32, #tpu.memory_space<vmem>>, vector<32x1xf32>
    %4 = vector.broadcast %3 : vector<32x1xf32> to vector<32x16xf32>
    %5 = arith.addf %2, %4 : vector<32x16xf32>
    %cst_5 = arith.constant 0.000000e+00 : f32
    %6 = vector.broadcast %cst_5 : f32 to vector<32x16xf32>
    %7 = arith.maximumf %5, %6 : vector<32x16xf32>
    %c0_6 = arith.constant 0 : index
    %c0_7 = arith.constant 0 : index
    %8 = vector.load %arg2[%c0_6, %c0_7] : memref<1x16xf32, #tpu.memory_space<vmem>>, vector<1x16xf32>
    %9 = vector.broadcast %8 : vector<1x16xf32> to vector<32x16xf32>
    %10 = arith.mulf %7, %9 : vector<32x16xf32>
    %c0_8 = arith.constant 0 : index
    %c0_9 = arith.constant 0 : index
    %11 = vector.load %arg5[%c0_8, %c0_9] : memref<2x32xbf16, #tpu.memory_space<vmem>>, vector<2x32xbf16>
    %12 = arith.truncf %10 : vector<32x16xf32> to vector<32x16xbf16>
    %cst_10 = arith.constant dense<0.000000e+00> : vector<2x16xf32>
    %13 = tpu.matmul %11, %12, %cst_10 {dimension_numbers = #tpu.dot_dimension_numbers<[1], [0], [0], [1], [0, 0, 1, 1], [], []>} : vector<2x32xbf16>, vector<32x16xbf16>, vector<2x16xf32> -> vector<2x16xf32>
    %c0_11 = arith.constant 0 : index
    %c0_12 = arith.constant 0 : index
    %14 = vector.load %arg6[%c0_11, %c0_12] : memref<2x1xf32, #tpu.memory_space<vmem>>, vector<2x1xf32>
    %15 = vector.broadcast %14 : vector<2x1xf32> to vector<2x16xf32>
    %16 = arith.addf %13, %15 : vector<2x16xf32>
    %17 = vector.extract_strided_slice %16 {offsets = [0, 0], sizes = [1, 8], strides = [1, 1]} : vector<2x16xf32> to vector<1x8xf32>
    %18 = vector.extract_strided_slice %16 {offsets = [0, 8], sizes = [1, 8], strides = [1, 1]} : vector<2x16xf32> to vector<1x8xf32>
    %19 = tpu.concatenate %17, %18 in 0 : vector<1x8xf32>, vector<1x8xf32> -> vector<2x8xf32>
    %20 = vector.extract_strided_slice %16 {offsets = [1, 0], sizes = [1, 8], strides = [1, 1]} : vector<2x16xf32> to vector<1x8xf32>
    %21 = vector.extract_strided_slice %16 {offsets = [1, 8], sizes = [1, 8], strides = [1, 1]} : vector<2x16xf32> to vector<1x8xf32>
    %22 = tpu.concatenate %20, %21 in 0 : vector<1x8xf32>, vector<1x8xf32> -> vector<2x8xf32>
    %23 = arith.truncf %19 : vector<2x8xf32> to vector<2x8xbf16>
    %c0_13 = arith.constant 0 : index
    %c0_14 = arith.constant 0 : index
    %24 = vector.load %arg7[%c0_13, %c0_14] : memref<8x8xbf16, #tpu.memory_space<vmem>>, vector<8x8xbf16>
    %cst_15 = arith.constant dense<0.000000e+00> : vector<2x8xf32>
    %25 = tpu.matmul %23, %24, %cst_15 {dimension_numbers = #tpu.dot_dimension_numbers<[1], [0], [0], [1], [0, 0, 1, 1], [], []>} : vector<2x8xbf16>, vector<8x8xbf16>, vector<2x8xf32> -> vector<2x8xf32>
    %c0_16 = arith.constant 0 : index
    %c0_17 = arith.constant 0 : index
    %26 = vector.load %arg8[%c0_16, %c0_17] : memref<1x8xf32, #tpu.memory_space<vmem>>, vector<1x8xf32>
    %27 = vector.broadcast %26 : vector<1x8xf32> to vector<2x8xf32>
    %28 = arith.addf %25, %27 : vector<2x8xf32>
    %c0_18 = arith.constant 0 : index
    %c0_19 = arith.constant 0 : index
    %29 = vector.load %arg11[%c0_18, %c0_19] : memref<2x8xf32, #tpu.memory_space<vmem>>, vector<2x8xf32>
    tpu.vector_store %arg11[%c0_18, %c0_19], %28 {strides = array<i32>} : memref<2x8xf32, #tpu.memory_space<vmem>>, vector<2x8xf32>,
    %30 = arith.truncf %22 : vector<2x8xf32> to vector<2x8xbf16>
    %c0_20 = arith.constant 0 : index
    %c0_21 = arith.constant 0 : index
    %31 = vector.load %arg9[%c0_20, %c0_21] : memref<8x8xbf16, #tpu.memory_space<vmem>>, vector<8x8xbf16>
    %cst_22 = arith.constant dense<0.000000e+00> : vector<2x8xf32>
    %32 = tpu.matmul %30, %31, %cst_22 {dimension_numbers = #tpu.dot_dimension_numbers<[1], [0], [0], [1], [0, 0, 1, 1], [], []>} : vector<2x8xbf16>, vector<8x8xbf16>, vector<2x8xf32> -> vector<2x8xf32>
    %c0_23 = arith.constant 0 : index
    %c0_24 = arith.constant 0 : index
    %33 = vector.load %arg10[%c0_23, %c0_24] : memref<1x8xf32, #tpu.memory_space<vmem>>, vector<1x8xf32>
    %34 = vector.broadcast %33 : vector<1x8xf32> to vector<2x8xf32>
    %35 = arith.addf %32, %34 : vector<2x8xf32>
    %c0_25 = arith.constant 0 : index
    %c0_26 = arith.constant 0 : index
    %36 = vector.load %arg12[%c0_25, %c0_26] : memref<2x8xf32, #tpu.memory_space<vmem>>, vector<2x8xf32>
    tpu.vector_store %arg12[%c0_25, %c0_26], %35 {strides = array<i32>} : memref<2x8xf32, #tpu.memory_space<vmem>>, vector<2x8xf32>,
    return
  }
  func.func @transform_0(%arg0: i32) -> (i32, i32) {
    %c0_i32 = arith.constant 0 : i32
    %c0_i32_0 = arith.constant 0 : i32
    %c0_i32_1 = arith.constant 0 : i32
    return %c0_i32, %c0_i32_0 : i32, i32
  }
  func.func @transform_1(%arg0: i32) -> (i32, i32) {
    %c0_i32 = arith.constant 0 : i32
    %c0_i32_0 = arith.constant 0 : i32
    %c0_i32_1 = arith.constant 0 : i32
    return %c0_i32, %c0_i32_0 : i32, i32
  }
  func.func @transform_2(%arg0: i32) -> (i32, i32) {
    %c0_i32 = arith.constant 0 : i32
    %c0_i32_0 = arith.constant 0 : i32
    %c0_i32_1 = arith.constant 0 : i32
    return %c0_i32, %c0_i32_0 : i32, i32
  }
  func.func @transform_3(%arg0: i32) -> (i32, i32) {
    %c0_i32 = arith.constant 0 : i32
    %c0_i32_0 = arith.constant 0 : i32
    %c0_i32_1 = arith.constant 0 : i32
    return %c0_i32, %c0_i32_0 : i32, i32
  }
  func.func @transform_4(%arg0: i32) -> (i32, i32) {
    %c0_i32 = arith.constant 0 : i32
    %c0_i32_0 = arith.constant 0 : i32
    %c0_i32_1 = arith.constant 0 : i32
    return %c0_i32, %c0_i32_0 : i32, i32
  }
  func.func @transform_5(%arg0: i32) -> (i32, i32) {
    %c0_i32 = arith.constant 0 : i32
    %c0_i32_0 = arith.constant 0 : i32
    %c0_i32_1 = arith.constant 0 : i32
    return %c0_i32, %c0_i32_0 : i32, i32
  }
  func.func @transform_6(%arg0: i32) -> (i32, i32) {
    %c0_i32 = arith.constant 0 : i32
    %c0_i32_0 = arith.constant 0 : i32
    %c0_i32_1 = arith.constant 0 : i32
    return %c0_i32, %c0_i32_0 : i32, i32
  }
  func.func @transform_7(%arg0: i32) -> (i32, i32) {
    %c0_i32 = arith.constant 0 : i32
    %c0_i32_0 = arith.constant 0 : i32
    %c0_i32_1 = arith.constant 0 : i32
    return %c0_i32, %c0_i32_0 : i32, i32
  }
  func.func @transform_8(%arg0: i32) -> (i32, i32) {
    %c0_i32 = arith.constant 0 : i32
    %c0_i32_0 = arith.constant 0 : i32
    %c0_i32_1 = arith.constant 0 : i32
    return %c0_i32, %c0_i32_0 : i32, i32
  }
  func.func @transform_9(%arg0: i32) -> (i32, i32) {
    %c0_i32 = arith.constant 0 : i32
    %c0_i32_0 = arith.constant 0 : i32
    %c0_i32_1 = arith.constant 0 : i32
    return %c0_i32, %c0_i32_0 : i32, i32
  }
  func.func @transform_10(%arg0: i32) -> (i32, i32) {
    %c0_i32 = arith.constant 0 : i32
    %c0_i32_0 = arith.constant 0 : i32
    %c0_i32_1 = arith.constant 0 : i32
    return %c0_i32, %c0_i32_0 : i32, i32
  }
  func.func @transform_11(%arg0: i32) -> (i32, i32) {
    %c0_i32 = arith.constant 0 : i32
    %c0_i32_0 = arith.constant 0 : i32
    %c0_i32_1 = arith.constant 0 : i32
    return %c0_i32, %c0_i32_0 : i32, i32
  }
}

</mosaic_0001>

<bundles_post_ra>
// kernel: _qa_forward.1
= control target key start
LH: loop header
LB: loop body
LE: loop exit
PB: predicated region body
PF: predicated region fallthrough
CT: control target
= control target key end

     0   :  { %17 = vsyncpa [#allocation3], 0  ;;  %v349_v1 = vmov 0   ;;  %s467_s0 = inlined_call_operand.vmem [shape: bf16[32,16], index: 0, kind: input, shape index: {}]   ;;  %s468_s1 = inlined_call_operand.vmem [shape: f32[1,16], index: 1, kind: input, shape index: {}]   ;;  %s469_s2 = inlined_call_operand.vmem [shape: bf16[32,32], index: 2, kind: input, shape index: {}]   ;;  %s470_s3 = inlined_call_operand.vmem [shape: f32[32,1], index: 3, kind: input, shape index: {}]   ;;  %s471_s4 = inlined_call_operand.vmem [shape: bf16[2,32], index: 4, kind: input, shape index: {}]   ;;  %s472_s5 = inlined_call_operand.vmem [shape: f32[2,1], index: 5, kind: input, shape index: {}]   ;;  %s473_s6 = inlined_call_operand.vmem [shape: bf16[8,8], index: 6, kind: input, shape index: {}]   ;;  %s474_s7 = inlined_call_operand.vmem [shape: f32[1,8], index: 7, kind: input, shape index: {}]   ;;  %s475_s8 = inlined_call_operand.vmem [shape: bf16[8,8], index: 8, kind: input, shape index: {}]   ;;  %s476_s9 = inlined_call_operand.vmem [shape: f32[1,8], index: 9, kind: input, shape index: {}]   ;;  %s477_s10 = inlined_call_operand.hbm [shape: f32[2,8], index: 10, kind: output, shape index: {0}]   ;;  %s478_s11 = inlined_call_operand.hbm [shape: f32[2,8], index: 11, kind: output, shape index: {1}]  }
   0x1   :  { %v281_v0 = vld [vmem:[%s467_s0 + $0x8] sm:$0xff]  ;;  %287 = vset.pattern.permute.xlu1 %v349_v1  ;;  %v48_v2 = vld [vmem:[%s470_s3] sm:$0xff]  ;;  %286 = vset.pattern.permute.xlu0 %v349_v1  ;;  %v50_v3 = vld [vmem:[%s470_s3 + $0x10] sm:$0xff] }
   0x2   :  { %107 = vmatpush.bf16.msra.mxu0 %v281_v0  ;;  %v280_v4 = vld [vmem:[%s467_s0] sm:$0xff]  ;;  %54 = vperm.xlu1 %287, %v48_v2  }
   0x3   :  { %64 = vperm.xlu0 %286, %v50_v3   ;;  %288 = vset.pattern.permute.xlu2 %v349_v1 }
   0x4   :  { %18 = vsyncpa [#allocation5], 0  ;;  %v278_v5 = vld [vmem:[%s469_s2] sm:$0xff]  ;;  %vm94_vm0 = vcmask 261120   ;;  %v49_v6 = vld [vmem:[%s470_s3 + $0x8] sm:$0xff]  ;;  %vm180_vm1 = vcmask 1043456  }
   0x5   :  { %v51_v7 = vld [vmem:[%s470_s3 + $0x18] sm:$0xff]  ;;  %v279_v8 = vld [vmem:[%s469_s2 + $0x8] sm:$0xff]  ;;  %v135_v11 = vld [vmem:[%s472_s5] sm:$0x3]  ;;  %vm162_vm2 = vcmask 1040384   ;;  %vm176_vm3 = vcmask 64512  }
   0x6   :  { %108 = vmatpush.bf16.msra.mxu0 %v280_v4  ;;  %138 = vperm.xlu2 %288, %v135_v11   ;;  %v294_v23 = vld [vmem:[%s468_s1] ss:$0 sm:$0xff]  ;;  %s350_s1 = smov 120   ;;  %s351_s21 = smov [#allocation4]   ;;  %vm197_vm4 = vcmask 58368  }
   0x7   :  { %v132_v33 = vld [vmem:[%s471_s4] sm:$0x1]  ;;  %s241_s22 = sshll.u32 %s351_s21, 4  ;;  %s243_s25 = sshll.u32 %s478_s11, 4  ;;  %s242_s22 = int_to_ptr.vmem [resolvable:$true] %s241_s22  ;;  %s244_s25 = int_to_ptr.hbm [resolvable:$true] %s243_s25 }
   0x8   :  { %v171_v40 = vld [vmem:[%s473_s6] sm:$0xf]  ;;  %s352_s26 = smov [#allocation2]   ;;  %s232_s30 = sshll.u32 %s477_s10, 4  ;;  %s233_s30 = int_to_ptr.hbm [resolvable:$true] %s232_s30 }
   0x9   :  { %273 = vmatmul.msk.bf16.vlgmr.msra.gmra.mxu0 %vm94_vm0, %v278_v5  ;;  %v200_v41 = vld [vmem:[%s475_s8] sm:$0xf]  ;;  %v182_v42 = vsel %vm180_vm1, %v171_v40, 0  ;;  %s230_s27 = sshll.u32 %s352_s26, 4  ;;  %s231_s27 = int_to_ptr.vmem [resolvable:$true] %s230_s27 }
   0xa   :  { %59 = vperm.xlu1 %287, %v49_v6   ;;  %v209_v43 = vsel %vm180_vm1, %v200_v41, 0  ;;  %191 = vmatpush.bf16.msra.mxu2 %v182_v42  ;;  %v295_v52 = vld [vmem:[%s474_s7] ss:$0 sm:$0xff] }
   0xb   :  { %69 = vperm.xlu0 %286, %v51_v7   ;;  %218 = vmatpush.bf16.msra.mxu3 %v209_v43  ;;  %v296_v53 = vld [vmem:[%s476_s9] ss:$0 sm:$0xff] }
  0x19   :  { %274 = vmatmul.msk.bf16.gmra.mxu0 %vm94_vm0, %v279_v8 }
  0x60   :  { %v139_v34 = vpop.permute.xlu2 %138 }
  0x74   :  { %v55_v12 = vpop.permute.xlu1 %54 }
  0x75   :  { %v65_v13 = vpop.permute.xlu0 %64 }
  0x7c   :  { %v60_v15 = vpop.permute.xlu1 %59 }
  0x7d   :  { %v70_v18 = vpop.permute.xlu0 %69 }
  0x86   :  { %v110_v9 = vpop.f32.mrf.mxu0 }
  0x87   :  { %v111_v20 = vadd.f32 %v110_v9, %v55_v12 }
  0x89   :  { %v120_v26 = vmax.f32 %v111_v20, 0.0 }
  0x8b   :  { %v128_v31 = vmul.f32 %v294_v23, %v120_v26 }
  0x8e   :  { %v112_v10 = vpop.f32.mrf.mxu0 }
  0x8f   :  { %v113_v17 = vadd.f32 %v112_v10, %v60_v15 }
  0x91   :  { %v121_v24 = vmax.f32 %v113_v17, 0.0 }
  0x93   :  { %v129_v29 = vmul.f32 %v294_v23, %v121_v24 }
  0x95   :  { %v133_v32 = vpack.c.bf16 %v129_v29, %v128_v31 }
  0x96   :  { %v115_v14 = vpop.f32.mrf.mxu0 }
  0x97   :  { %v116_v16 = vadd.f32 %v115_v14, %v65_v13 }
  0x99   :  { %v122_v21 = vmax.f32 %v116_v16, 0.0 }
  0x9b   :  { %v130_v27 = vmul.f32 %v294_v23, %v122_v21 }
  0x9e   :  { %v117_v19 = vpop.f32.mrf.mxu0 }
  0x9f   :  { %v118_v22 = vadd.f32 %v117_v19, %v70_v18 }
  0xa1   :  { %v123_v25 = vmax.f32 %v118_v22, 0.0 }
  0xa3   :  { %v131_v28 = vmul.f32 %v294_v23, %v123_v25 }
  0xa5   :  { %v134_v30 = vpack.c.bf16 %v131_v28, %v130_v27 }
  0xa7   :  { %150 = vmatpush.bf16.msra.mxu1 %v134_v30 }
  0xab   :  { %151 = vmatpush.bf16.msra.mxu1 %v133_v32 }
  0xae   :  { %275 = vmatmul.msk.bf16.vlgmr.msra.gmra.mxu1 %vm94_vm0, %v132_v33 }
 0x12b   :  { %v153_v35 = vpop.f32.mrf.mxu1 }
 0x12c   :  { %v154_v36 = vadd.f32 %v153_v35, %v139_v34 }
 0x12e   :  { %v158_v37 = vrot.slane %v154_v36, 7  ;;  %v164_v45 = vrot.slane %v154_v36, 1 }
 0x130   :  { %v289_v38 = vpack.i.bf16 %v154_v36, %v158_v37 }
 0x132   :  { %290 = vrot.lane.b32.xlu2 %v289_v38, %s350_s1 }
 0x133   :  { %v155_v39 = vpop.f32.mrf.mxu1 }
 0x18c   :  { %v291_v44 = vpop.permute.xlu2 %290 }
 0x18d   :  { %v293_v46 = vunpack.i.h.bf16 %v291_v44  ;;  %v292_v47 = vunpack.i.l.bf16 %v291_v44 }
 0x18f   :  { %v163_v48 = vsel %vm162_vm2, %v154_v36, %v292_v47  ;;  %v169_v49 = vsel %vm162_vm2, %v164_v45, %v293_v46 }
 0x190   :  { %v170_v50 = vpack.c.bf16 %v163_v48, %v163_v48  ;;  %v199_v51 = vpack.c.bf16 %v169_v49, %v169_v49 }
 0x192   :  { %276 = vmatmul.msk.bf16.vlgmr.msra.gmra.mxu2 %vm176_vm3, %v170_v50  ;;  %277 = vmatmul.msk.bf16.vlgmr.msra.gmra.mxu3 %vm176_vm3, %v199_v51 }
 0x215   :  { %v193_v54 = vpop.f32.mrf.mxu2  ;;  %v220_v55 = vpop.f32.mrf.mxu3 }
 0x216   :  { %v194_v56 = vadd.f32 %v295_v52, %v193_v54  ;;  %v221_v57 = vadd.f32 %v296_v53, %v220_v55 }
 0x218   :  { %224 = vst.msk [vmem:[#allocation4] sm:$0x3] %vm197_vm4, %v221_v57 }
 0x219   :  { %198 = vst.msk [vmem:[#allocation2] sm:$0x3] %vm197_vm4, %v194_v56  ;;  %246 = dma.vmem_to_hbm [thread:$0]  %s242_s22, 32, %s244_s25, [#allocation5]  }
 0x21a   :  { %235 = dma.vmem_to_hbm [thread:$0]  %s231_s27, 32, %s233_s30, [#allocation3]  }
 0x21d   :  { %v195_v58 = vpop.f32.mrf.mxu2  ;;  %v222_v59 = vpop.f32.mrf.mxu3 }
 0x21e   :  { %345 = dma.done.wait [#allocation3], 32  }
 0x21f   :  { %346 = vsyncadd [#allocation3], 4294967264 }
 0x220   :  { %347 = dma.done.wait [#allocation5], 32  }
 0x221   :  { %348 = vsyncadd [#allocation5], 4294967264 }
 0x222   :  { %255 = vsyncpa [#allocation3], 1 }
 0x223   :  { %256 = vsyncpa [#allocation5], 1 }

</bundles_post_ra>
